<compile_context>
chip_gen: v6e
topology: v6e:2x2x1
jax: 0.10.0
libtpu: 0.0.40
codegen_flags: <defaults>
</compile_context>

<pallas_src>
import jax
import jax.numpy as jnp
from jax.experimental import pallas as pl
from jax.experimental.pallas import tpu as pltpu


def mlp_kernel(x_ref, w1_ref, b1_ref, w2_ref, b2_ref, o_ref):
    # hidden = relu(x @ W1 + b1); bf16 operands, f32 accumulation.
    h = jnp.dot(x_ref[...], w1_ref[...], preferred_element_type=jnp.float32)
    h = jnp.maximum(h + b1_ref[...], 0.0)
    # out = hidden @ W2 + b2 ; second MXU pass also bf16-in / f32-acc.
    o = jnp.dot(h.astype(w2_ref.dtype), w2_ref[...],
                preferred_element_type=jnp.float32)
    o_ref[...] = (o + b2_ref[...]).astype(o_ref.dtype)


def _round_up(n, m):
    return (n + m - 1) // m * m


def _vmem_limit_bytes():
    """3/4 of physical VMEM: ~48 MiB on v7x, ~96 MiB on v5e/v6e."""
    try:
        phys = pltpu.get_tpu_info().vmem_capacity_bytes
    except Exception:
        phys = 64 << 20  # conservative (v7x per-TensorCore)
    return int(phys) * 3 // 4


def _choose_tile_b(B, dimIn, dimHid, dimOut, vmem_limit):
    """Largest batch tile (multiple of 16) fitting the VMEM budget."""
    # Per-row bytes: double-buffered bf16 x row, double-buffered f32 out row,
    # plus the f32 hidden intermediate.
    per_row = 2 * dimIn * 2 + 2 * dimOut * 4 + dimHid * 4
    weights = (dimIn * dimHid + dimHid * dimOut) * 2 + (dimHid + dimOut) * 4
    headroom = 8 << 20  # compiler-internal scratch / pipeline bookkeeping
    avail = max(vmem_limit - weights - headroom, per_row * 16)
    tile = min(avail // per_row, 2048)
    if B > 32:
        # Keep >= 2 batch tiles so both v7x TensorCores get work.
        tile = min(tile, _round_up(pl.cdiv(B, 2), 16))
    tile = max(16, (tile // 16) * 16)
    tile = min(tile, _round_up(B, 16))
    return int(tile)


def _mlp_forward_impl(x, w1, b1, w2, b2, tile_b, single_buffer_weights):
    B, dimIn = x.shape
    dimHid = w1.shape[1]
    dimOut = w2.shape[1]

    vmem_limit = _vmem_limit_bytes()
    if tile_b is None:
        tile_b = _choose_tile_b(B, dimIn, dimHid, dimOut, vmem_limit)
    tile_b = max(16, _round_up(min(int(tile_b), _round_up(B, 16)), 16))
    b_p = _round_up(B, tile_b)

    # bf16 feeds the MXU; only the batch axis is zero-padded (padded rows are
    # computed but sliced off afterwards, so semantics are unchanged).
    xb = jnp.pad(x.astype(jnp.bfloat16), ((0, b_p - B), (0, 0)))
    w1b = w1.astype(jnp.bfloat16)
    w2b = w2.astype(jnp.bfloat16)
    b1r = b1.reshape(1, dimHid).astype(jnp.float32)
    b2r = b2.reshape(1, dimOut).astype(jnp.float32)

    grid = (b_p // tile_b,)

    if single_buffer_weights:
        def resident(shape):
            # Constant index_map -> never re-fetched; single buffer saves VMEM.
            return pl.BlockSpec(shape, lambda i: (0, 0),
                                pipeline_mode=pl.Buffered(1))
    else:
        def resident(shape):
            return pl.BlockSpec(shape, lambda i: (0, 0))

    flops = 2 * b_p * (dimIn * dimHid + dimHid * dimOut)
    bytes_accessed = (xb.size * 2 + w1b.size * 2 + w2b.size * 2
                      + b1r.size * 4 + b2r.size * 4 + b_p * dimOut * 4)

    out_p = pl.pallas_call(
        mlp_kernel,
        out_shape=jax.ShapeDtypeStruct((b_p, dimOut), jnp.float32),
        grid=grid,
        in_specs=[
            pl.BlockSpec((tile_b, dimIn), lambda i: (i, 0)),  # x: batch-tiled
            resident((dimIn, dimHid)),                        # W1: VMEM-resident
            resident((1, dimHid)),                            # b1: VMEM-resident
            resident((dimHid, dimOut)),                       # W2: VMEM-resident
            resident((1, dimOut)),                            # b2: VMEM-resident
        ],
        out_specs=pl.BlockSpec((tile_b, dimOut), lambda i: (i, 0)),
        compiler_params=pltpu.CompilerParams(
            dimension_semantics=("parallel",),   # batch tiles shard across TCs
            vmem_limit_bytes=vmem_limit,
        ),
        cost_estimate=pl.CostEstimate(
            flops=flops, transcendentals=0, bytes_accessed=bytes_accessed),
    )(xb, w1b, b1r, w2b, b2r)

    return out_p[:B, :]


_mlp_forward_jit = jax.jit(_mlp_forward_impl, static_argnums=(5, 6))


def mlp_forward(x, w1, b1, w2, b2, *, tile_b=None):
    """x: (B, dimIn); w1: (dimIn, dimHid); b1: (dimHid,);
       w2: (dimHid, dimOut); b2: (dimOut,). Returns (B, dimOut) float32."""
    try:
        return _mlp_forward_jit(x, w1, b1, w2, b2, tile_b, True)
    except Exception:
        # Fallback if this JAX build rejects single-buffered BlockSpecs.
        return _mlp_forward_jit(x, w1, b1, w2, b2, tile_b, False)


def mlp_reference(x, w1, b1, w2, b2):
    h = jnp.maximum(x @ w1 + b1, 0.0)
    return h @ w2 + b2


if __name__ == "__main__":
    # Shapes implied by MLP(dimIn, dimHid, dimOut=1); tile_b=16 exercises the
    # batch-tiled grid path (grid of 2 tiles) with bf16-legal 16-row tiles.
    batch, dimIn, dimHid, dimOut = 32, 32, 64, 1

    key = jax.random.PRNGKey(0)
    kx, kw1, kb1, kw2, kb2 = jax.random.split(key, 5)

    x = jax.random.normal(kx, (batch, dimIn), dtype=jnp.float32)
    w1 = jax.random.normal(kw1, (dimIn, dimHid), dtype=jnp.float32) * 0.1
    b1 = jax.random.normal(kb1, (dimHid,), dtype=jnp.float32) * 0.1
    w2 = jax.random.normal(kw2, (dimHid, dimOut), dtype=jnp.float32) * 0.1
    b2 = jax.random.normal(kb2, (dimOut,), dtype=jnp.float32) * 0.1

    out = mlp_forward(x, w1, b1, w2, b2, tile_b=16)
    out = jax.block_until_ready(out)

    ref = mlp_reference(x, w1, b1, w2, b2)
    assert out.shape == (batch, dimOut), out.shape
    # bf16 MXU path -> relaxed tolerance vs. f32 reference.
    assert jnp.allclose(out, ref, atol=2e-2, rtol=2e-2), "mismatch vs reference"

    print("KERNEL_OK")
</pallas_src>

<mosaic_0001>
module attributes {stable_mosaic.version = 11 : i64} {
  func.func @mlp_kernel(%arg0: i32, %arg1: memref<16x32xbf16, #tpu.memory_space<vmem>>, %arg2: memref<32x64xbf16, #tpu.memory_space<vmem>>, %arg3: memref<1x64xf32, #tpu.memory_space<vmem>>, %arg4: memref<64x1xbf16, #tpu.memory_space<vmem>>, %arg5: memref<1x1xf32, #tpu.memory_space<vmem>>, %arg6: memref<16x1xf32, #tpu.memory_space<vmem>>) attributes {dimension_semantics = [#tpu.dimension_semantics<parallel>], iteration_bounds = array<i64: 2>, scalar_prefetch = 0 : i64, scratch_operands = 0 : i64, tpu.core_type = #tpu.core_type<tc>, window_params = [{transform_indices = @transform_0, window_bounds = array<i64: 16, 32>}, {pipeline_mode = #tpu.pipeline_mode<synchronous>, transform_indices = @transform_1, window_bounds = array<i64: 32, 64>}, {pipeline_mode = #tpu.pipeline_mode<synchronous>, transform_indices = @transform_2, window_bounds = array<i64: 1, 64>}, {pipeline_mode = #tpu.pipeline_mode<synchronous>, transform_indices = @transform_3, window_bounds = array<i64: 64, 1>}, {pipeline_mode = #tpu.pipeline_mode<synchronous>, transform_indices = @transform_4, window_bounds = array<i64: 1, 1>}, {transform_indices = @transform_5, window_bounds = array<i64: 16, 1>}]} {
    %c0 = arith.constant 0 : index
    %c0_0 = arith.constant 0 : index
    %0 = vector.load %arg1[%c0, %c0_0] : memref<16x32xbf16, #tpu.memory_space<vmem>>, vector<16x32xbf16>
    %c0_1 = arith.constant 0 : index
    %c0_2 = arith.constant 0 : index
    %1 = vector.load %arg2[%c0_1, %c0_2] : memref<32x64xbf16, #tpu.memory_space<vmem>>, vector<32x64xbf16>
    %cst = arith.constant dense<0.000000e+00> : vector<16x64xf32>
    %2 = tpu.matmul %0, %1, %cst {dimension_numbers = #tpu.dot_dimension_numbers<[1], [0], [0], [1], [0, 0, 1, 1], [], []>} : vector<16x32xbf16>, vector<32x64xbf16>, vector<16x64xf32> -> vector<16x64xf32>
    %c0_3 = arith.constant 0 : index
    %c0_4 = arith.constant 0 : index
    %3 = vector.load %arg3[%c0_3, %c0_4] : memref<1x64xf32, #tpu.memory_space<vmem>>, vector<1x64xf32>
    %4 = vector.broadcast %3 : vector<1x64xf32> to vector<16x64xf32>
    %5 = arith.addf %2, %4 : vector<16x64xf32>
    %cst_5 = arith.constant 0.000000e+00 : f32
    %6 = vector.broadcast %cst_5 : f32 to vector<16x64xf32>
    %7 = arith.maximumf %5, %6 : vector<16x64xf32>
    %8 = arith.truncf %7 : vector<16x64xf32> to vector<16x64xbf16>
    %c0_6 = arith.constant 0 : index
    %c0_7 = arith.constant 0 : index
    %9 = vector.load %arg4[%c0_6, %c0_7] : memref<64x1xbf16, #tpu.memory_space<vmem>>, vector<64x1xbf16>
    %cst_8 = arith.constant dense<0.000000e+00> : vector<16x1xf32>
    %10 = tpu.matmul %8, %9, %cst_8 {dimension_numbers = #tpu.dot_dimension_numbers<[1], [0], [0], [1], [0, 0, 1, 1], [], []>} : vector<16x64xbf16>, vector<64x1xbf16>, vector<16x1xf32> -> vector<16x1xf32>
    %c0_9 = arith.constant 0 : index
    %c0_10 = arith.constant 0 : index
    %11 = vector.load %arg5[%c0_9, %c0_10] : memref<1x1xf32, #tpu.memory_space<vmem>>, vector<1x1xf32>
    %12 = vector.broadcast %11 : vector<1x1xf32> to vector<16x1xf32>
    %13 = arith.addf %10, %12 : vector<16x1xf32>
    %c0_11 = arith.constant 0 : index
    %c0_12 = arith.constant 0 : index
    %14 = vector.load %arg6[%c0_11, %c0_12] : memref<16x1xf32, #tpu.memory_space<vmem>>, vector<16x1xf32>
    tpu.vector_store %arg6[%c0_11, %c0_12], %13 {strides = array<i32>} : memref<16x1xf32, #tpu.memory_space<vmem>>, vector<16x1xf32>,
    return
  }
  func.func @transform_0(%arg0: i32) -> (i32, i32) {
    %c0_i32 = arith.constant 0 : i32
    %c0_i32_0 = arith.constant 0 : i32
    return %arg0, %c0_i32 : i32, i32
  }
  func.func @transform_1(%arg0: i32) -> (i32, i32) {
    %c0_i32 = arith.constant 0 : i32
    %c0_i32_0 = arith.constant 0 : i32
    %c0_i32_1 = arith.constant 0 : i32
    return %c0_i32, %c0_i32_0 : i32, i32
  }
  func.func @transform_2(%arg0: i32) -> (i32, i32) {
    %c0_i32 = arith.constant 0 : i32
    %c0_i32_0 = arith.constant 0 : i32
    %c0_i32_1 = arith.constant 0 : i32
    return %c0_i32, %c0_i32_0 : i32, i32
  }
  func.func @transform_3(%arg0: i32) -> (i32, i32) {
    %c0_i32 = arith.constant 0 : i32
    %c0_i32_0 = arith.constant 0 : i32
    %c0_i32_1 = arith.constant 0 : i32
    return %c0_i32, %c0_i32_0 : i32, i32
  }
  func.func @transform_4(%arg0: i32) -> (i32, i32) {
    %c0_i32 = arith.constant 0 : i32
    %c0_i32_0 = arith.constant 0 : i32
    %c0_i32_1 = arith.constant 0 : i32
    return %c0_i32, %c0_i32_0 : i32, i32
  }
  func.func @transform_5(%arg0: i32) -> (i32, i32) {
    %c0_i32 = arith.constant 0 : i32
    %c0_i32_0 = arith.constant 0 : i32
    return %arg0, %c0_i32 : i32, i32
  }
}

module attributes {stable_mosaic.version = 11 : i64} {
  func.func @mlp_kernel(%arg0: i32, %arg1: memref<16x32xbf16, #tpu.memory_space<vmem>>, %arg2: memref<32x64xbf16, #tpu.memory_space<vmem>>, %arg3: memref<1x64xf32, #tpu.memory_space<vmem>>, %arg4: memref<64x1xbf16, #tpu.memory_space<vmem>>, %arg5: memref<1x1xf32, #tpu.memory_space<vmem>>, %arg6: memref<16x1xf32, #tpu.memory_space<vmem>>) attributes {dimension_semantics = [#tpu.dimension_semantics<parallel>], iteration_bounds = array<i64: 2>, scalar_prefetch = 0 : i64, scratch_operands = 0 : i64, tpu.core_type = #tpu.core_type<tc>, window_params = [{transform_indices = @transform_0, window_bounds = array<i64: 16, 32>}, {pipeline_mode = #tpu.pipeline_mode<synchronous>, transform_indices = @transform_1, window_bounds = array<i64: 32, 64>}, {pipeline_mode = #tpu.pipeline_mode<synchronous>, transform_indices = @transform_2, window_bounds = array<i64: 1, 64>}, {pipeline_mode = #tpu.pipeline_mode<synchronous>, transform_indices = @transform_3, window_bounds = array<i64: 64, 1>}, {pipeline_mode = #tpu.pipeline_mode<synchronous>, transform_indices = @transform_4, window_bounds = array<i64: 1, 1>}, {transform_indices = @transform_5, window_bounds = array<i64: 16, 1>}]} {
    %c0 = arith.constant 0 : index
    %c0_0 = arith.constant 0 : index
    %0 = vector.load %arg1[%c0, %c0_0] : memref<16x32xbf16, #tpu.memory_space<vmem>>, vector<16x32xbf16>
    %c0_1 = arith.constant 0 : index
    %c0_2 = arith.constant 0 : index
    %1 = vector.load %arg2[%c0_1, %c0_2] : memref<32x64xbf16, #tpu.memory_space<vmem>>, vector<32x64xbf16>
    %cst = arith.constant dense<0.000000e+00> : vector<16x64xf32>
    %2 = tpu.matmul %0, %1, %cst {dimension_numbers = #tpu.dot_dimension_numbers<[1], [0], [0], [1], [0, 0, 1, 1], [], []>} : vector<16x32xbf16>, vector<32x64xbf16>, vector<16x64xf32> -> vector<16x64xf32>
    %c0_3 = arith.constant 0 : index
    %c0_4 = arith.constant 0 : index
    %3 = vector.load %arg3[%c0_3, %c0_4] : memref<1x64xf32, #tpu.memory_space<vmem>>, vector<1x64xf32>
    %4 = vector.broadcast %3 : vector<1x64xf32> to vector<16x64xf32>
    %5 = arith.addf %2, %4 : vector<16x64xf32>
    %cst_5 = arith.constant 0.000000e+00 : f32
    %6 = vector.broadcast %cst_5 : f32 to vector<16x64xf32>
    %7 = arith.maximumf %5, %6 : vector<16x64xf32>
    %8 = arith.truncf %7 : vector<16x64xf32> to vector<16x64xbf16>
    %c0_6 = arith.constant 0 : index
    %c0_7 = arith.constant 0 : index
    %9 = vector.load %arg4[%c0_6, %c0_7] : memref<64x1xbf16, #tpu.memory_space<vmem>>, vector<64x1xbf16>
    %cst_8 = arith.constant dense<0.000000e+00> : vector<16x1xf32>
    %10 = tpu.matmul %8, %9, %cst_8 {dimension_numbers = #tpu.dot_dimension_numbers<[1], [0], [0], [1], [0, 0, 1, 1], [], []>} : vector<16x64xbf16>, vector<64x1xbf16>, vector<16x1xf32> -> vector<16x1xf32>
    %c0_9 = arith.constant 0 : index
    %c0_10 = arith.constant 0 : index
    %11 = vector.load %arg5[%c0_9, %c0_10] : memref<1x1xf32, #tpu.memory_space<vmem>>, vector<1x1xf32>
    %12 = vector.broadcast %11 : vector<1x1xf32> to vector<16x1xf32>
    %13 = arith.addf %10, %12 : vector<16x1xf32>
    %c0_11 = arith.constant 0 : index
    %c0_12 = arith.constant 0 : index
    %14 = vector.load %arg6[%c0_11, %c0_12] : memref<16x1xf32, #tpu.memory_space<vmem>>, vector<16x1xf32>
    tpu.vector_store %arg6[%c0_11, %c0_12], %13 {strides = array<i32>} : memref<16x1xf32, #tpu.memory_space<vmem>>, vector<16x1xf32>,
    return
  }
  func.func @transform_0(%arg0: i32) -> (i32, i32) {
    %c0_i32 = arith.constant 0 : i32
    %c0_i32_0 = arith.constant 0 : i32
    return %arg0, %c0_i32 : i32, i32
  }
  func.func @transform_1(%arg0: i32) -> (i32, i32) {
    %c0_i32 = arith.constant 0 : i32
    %c0_i32_0 = arith.constant 0 : i32
    %c0_i32_1 = arith.constant 0 : i32
    return %c0_i32, %c0_i32_0 : i32, i32
  }
  func.func @transform_2(%arg0: i32) -> (i32, i32) {
    %c0_i32 = arith.constant 0 : i32
    %c0_i32_0 = arith.constant 0 : i32
    %c0_i32_1 = arith.constant 0 : i32
    return %c0_i32, %c0_i32_0 : i32, i32
  }
  func.func @transform_3(%arg0: i32) -> (i32, i32) {
    %c0_i32 = arith.constant 0 : i32
    %c0_i32_0 = arith.constant 0 : i32
    %c0_i32_1 = arith.constant 0 : i32
    return %c0_i32, %c0_i32_0 : i32, i32
  }
  func.func @transform_4(%arg0: i32) -> (i32, i32) {
    %c0_i32 = arith.constant 0 : i32
    %c0_i32_0 = arith.constant 0 : i32
    %c0_i32_1 = arith.constant 0 : i32
    return %c0_i32, %c0_i32_0 : i32, i32
  }
  func.func @transform_5(%arg0: i32) -> (i32, i32) {
    %c0_i32 = arith.constant 0 : i32
    %c0_i32_0 = arith.constant 0 : i32
    return %arg0, %c0_i32 : i32, i32
  }
}

</mosaic_0001>

<bundles_post_ra>
// kernel: _mlp_forward_impl.1
= control target key start
LH: loop header
LB: loop body
LE: loop exit
PB: predicated region body
PF: predicated region fallthrough
CT: control target
= control target key end

     0   :  { %s562_s20 = smov 0   ;;  %s604_s0 = inlined_call_operand.vmem [shape: bf16[32,32], index: 0, kind: input, shape index: {}]   ;;  %s605_s1 = inlined_call_operand.vmem [shape: bf16[32,64], index: 1, kind: input, shape index: {}]   ;;  %s606_s2 = inlined_call_operand.vmem [shape: f32[1,64], index: 2, kind: input, shape index: {}]   ;;  %s607_s3 = inlined_call_operand.vmem [shape: bf16[64,1], index: 3, kind: input, shape index: {}]   ;;  %s608_s4 = inlined_call_operand.<no memory space> [shape: f32[1,1], index: 4, kind: input, shape index: {}]   ;;  %s609_s5 = inlined_call_operand.vmem [shape: f32[32,1], index: 5, kind: output, shape index: {}]  }
   0x1   :  { %v10_v0 = vstv %s608_s4 }
   0x2   :  { %11 = vst [vmem:[#allocation2] sm:$0x1] %v10_v0 }
   0x3 LB: > { %s452_s21 = sadd.s32 4294967295, %s525_s20   ;;  %p456_p0 = scmp.ge.s32.totalorder %s525_s20, 1  ;;  %s525_s20 = sphi %s562_s20, %s17_s20  }
   0x4   : > { %p190_p1 = scmp.lt.s32.totalorder %s525_s20, 3 }
   0x6   : > { %p191_p2 = pnand %p456_p0, %p190_p1 }
   0x7   : > { %s457_s25 = sshll.u32 (!%p191_p2), %s452_s21, 1 }
   0x8   : > { %194 = sbr.rel (%p191_p2) target bundleno = 425 (0x1a9), region = 40  ;;  %p219_p3 = scmp.lt.s32.totalorder (!%p191_p2), %s457_s25, 3 }
   0xd   : > { %v512_v1 = vld [vmem:[%s605_s1 + $0x8] sm:$0xff]   ;;  %v527_v2 = vmov 0.0   ;;  %v513_v3 = vld [vmem:[%s605_s1] sm:$0xff]   ;;  %vm528_vm0 = vmmov 0   ;;  %v515_v4 = vld [vmem:[%s607_s3 + $0x18] sm:$0xff]   ;;  %s611_s25 = smov (!%p219_p3, %s457_s25), 3 }
   0xe   : > { %482 = vmatprep.subr.bf16.mxu0 %v527_v2  ;;  %490 = vmatprep.subr.bf16.mxu1 %v527_v2  ;;  %s458_s28 = sshll.u32 %s611_s25, 2  ;;  %vm261_vm1 = vcmask 261120   ;;  %v516_v6 = vld [vmem:[%s607_s3 + $0x10] sm:$0xff]   ;;  %v517_v7 = vld [vmem:[%s607_s3 + $0x8] sm:$0xff]   ;;  %v518_v8 = vld [vmem:[%s607_s3] sm:$0xff]   ;;  %vm348_vm2 = vcmask 523264  }
   0xf   : > { %483 = vmatpush3.bf16.msra.mxu0 %v512_v1  ;;  %486 = vmatprep.mubr.msk.bf16.mxu0 %vm528_vm0, %v527_v2  ;;  %s222_s6 = scalar_lea.vmem %s604_s0, %s458_s28  ;;  %v461_v9 = vld [vmem:[%s606_s2] ss:$0 sm:$0xff]  ;;  %s460_s15 = sshll.u32 %s611_s25, 3  ;;  %vm393_vm3 = vcmask 7168  }
  0x10   : > { %484 = vmatprep.subr.bf16.mxu0 %v527_v2  ;;  %498 = vmatprep.mubr.msk.bf16.mxu1 %vm528_vm0, %v527_v2  ;;  %v514_v5 = vld [vmem:[%s222_s6] sm:$0xff]   ;;  %s228_s18 = scalar_lea.vmem %s609_s5, %s460_s15 }
  0x11   : > { %491 = vmatpush3.bf16.msra.mxu1 %v515_v4  ;;  %v466_v19 = vld [vmem:[#allocation2] ss:$0 sm:$0xff] }
  0x12   : > { %492 = vmatprep.subr.bf16.mxu1 %v527_v2 }
  0x13   : > { %485 = vmatpush3.bf16.msra.mxu0 %v513_v3 }
  0x15   : > { %493 = vmatpush3.bf16.msra.mxu1 %v516_v6 }
  0x16   : > { %487 = vmatmul.mubr.msk.bf16.vlgmr.msra.gmra.mxu0 %vm261_vm1, %v514_v5  ;;  %494 = vmatprep.subr.bf16.mxu1 %v527_v2 }
  0x19   : > { %495 = vmatpush3.bf16.msra.mxu1 %v517_v7 }
  0x1a   : > { %496 = vmatprep.subr.bf16.mxu1 %v527_v2 }
  0x1d   : > { %497 = vmatpush3.bf16.msra.mxu1 %v518_v8 }
  0xd6   : > { %v299_v10 = vpop.f32.mrf.mxu0 }
  0xd7   : > { %v300_v12 = vadd.f32 %v461_v9, %v299_v10 }
  0xd8   : > { %v488_v11 = vpop.f32.mrf.mxu0 }
  0xd9   : > { %v306_v16 = vmax.f32 %v300_v12, 0.0 }
  0xda   : > { %v302_v13 = vpop.f32.mrf.mxu0 }
  0xdb   : > { %v303_v14 = vadd.f32 %v461_v9, %v302_v13 }
  0xdc   : > { %v489_v15 = vpop.f32.mrf.mxu0 }
  0xdd   : > { %v307_v17 = vmax.f32 %v303_v14, 0.0 }
  0xdf   : > { %v308_v18 = vpack.c.bf16 %v307_v17, %v306_v16 }
  0xe1   : > { %499 = vmatmul.mubr.msk.bf16.vlgmr.msra.gmra.mxu1 %vm348_vm2, %v308_v18 }
 0x1a1   : > { %v386_v20 = vpop.f32.mrf.mxu1 }
 0x1a2   : > { %v387_v21 = vadd.f32 %v466_v19, %v386_v20 }
 0x1a3   : > { %v500_v22 = vpop.f32.mrf.mxu1 }
 0x1a4   : > { %394 = vst.msk [vmem:[%s228_s18] sm:$0xff] %vm393_vm3, %v387_v21 }
 0x1a5   : > { %v389_v23 = vpop.f32.mrf.mxu1 }
 0x1a6   : > { %v390_v24 = vadd.f32 %v466_v19, %v389_v23 }
 0x1a7   : > { %v501_v25 = vpop.f32.mrf.mxu1 }
 0x1a8   : > { %395 = vst.msk [vmem:[%s228_s18 + $0x8] sm:$0xff] %vm393_vm3, %v390_v24 }
 0x1a9 PF: > { %s17_s20 = sadd.s32 1, %s525_s20  }
 0x1aa   : > { %p14_p4 = scmp.ge.s32.totalorder %s17_s20, 4  }
 0x1ac   :  { %16 = sbr.rel (!%p14_p4) target bundleno = 3 (0x3), region = 70 }

// kernel: _mlp_forward_impl.1
= control target key start
LH: loop header
LB: loop body
LE: loop exit
PB: predicated region body
PF: predicated region fallthrough
CT: control target
= control target key end

     0   :  { %s562_s20 = smov 0   ;;  %s604_s0 = inlined_call_operand.vmem [shape: bf16[32,32], index: 0, kind: input, shape index: {}]   ;;  %s605_s1 = inlined_call_operand.vmem [shape: bf16[32,64], index: 1, kind: input, shape index: {}]   ;;  %s606_s2 = inlined_call_operand.vmem [shape: f32[1,64], index: 2, kind: input, shape index: {}]   ;;  %s607_s3 = inlined_call_operand.vmem [shape: bf16[64,1], index: 3, kind: input, shape index: {}]   ;;  %s608_s4 = inlined_call_operand.<no memory space> [shape: f32[1,1], index: 4, kind: input, shape index: {}]   ;;  %s609_s5 = inlined_call_operand.vmem [shape: f32[32,1], index: 5, kind: output, shape index: {}]  }
   0x1   :  { %v10_v0 = vstv %s608_s4 }
   0x2   :  { %11 = vst [vmem:[#allocation2] sm:$0x1] %v10_v0 }
   0x3 LB: > { %s452_s21 = sadd.s32 4294967295, %s525_s20   ;;  %p456_p0 = scmp.ge.s32.totalorder %s525_s20, 1  ;;  %s525_s20 = sphi %s562_s20, %s17_s20  }
   0x4   : > { %p190_p1 = scmp.lt.s32.totalorder %s525_s20, 3 }
   0x6   : > { %p191_p2 = pnand %p456_p0, %p190_p1 }
   0x7   : > { %s457_s25 = sshll.u32 (!%p191_p2), %s452_s21, 1 }
   0x8   : > { %194 = sbr.rel (%p191_p2) target bundleno = 425 (0x1a9), region = 40  ;;  %p219_p3 = scmp.lt.s32.totalorder (!%p191_p2), %s457_s25, 3 }
   0xd   : > { %v512_v1 = vld [vmem:[%s605_s1 + $0x8] sm:$0xff]   ;;  %v527_v2 = vmov 0.0   ;;  %v513_v3 = vld [vmem:[%s605_s1] sm:$0xff]   ;;  %vm528_vm0 = vmmov 0   ;;  %v515_v4 = vld [vmem:[%s607_s3 + $0x18] sm:$0xff]   ;;  %s611_s25 = smov (!%p219_p3, %s457_s25), 3 }
   0xe   : > { %482 = vmatprep.subr.bf16.mxu0 %v527_v2  ;;  %490 = vmatprep.subr.bf16.mxu1 %v527_v2  ;;  %s458_s28 = sshll.u32 %s611_s25, 2  ;;  %vm261_vm1 = vcmask 261120   ;;  %v516_v6 = vld [vmem:[%s607_s3 + $0x10] sm:$0xff]   ;;  %v517_v7 = vld [vmem:[%s607_s3 + $0x8] sm:$0xff]   ;;  %v518_v8 = vld [vmem:[%s607_s3] sm:$0xff]   ;;  %vm348_vm2 = vcmask 523264  }
   0xf   : > { %483 = vmatpush3.bf16.msra.mxu0 %v512_v1  ;;  %486 = vmatprep.mubr.msk.bf16.mxu0 %vm528_vm0, %v527_v2  ;;  %s222_s6 = scalar_lea.vmem %s604_s0, %s458_s28  ;;  %v461_v9 = vld [vmem:[%s606_s2] ss:$0 sm:$0xff]  ;;  %s460_s15 = sshll.u32 %s611_s25, 3  ;;  %vm393_vm3 = vcmask 7168  }
  0x10   : > { %484 = vmatprep.subr.bf16.mxu0 %v527_v2  ;;  %498 = vmatprep.mubr.msk.bf16.mxu1 %vm528_vm0, %v527_v2  ;;  %v514_v5 = vld [vmem:[%s222_s6] sm:$0xff]   ;;  %s228_s18 = scalar_lea.vmem %s609_s5, %s460_s15 }
  0x11   : > { %491 = vmatpush3.bf16.msra.mxu1 %v515_v4  ;;  %v466_v19 = vld [vmem:[#allocation2] ss:$0 sm:$0xff] }
  0x12   : > { %492 = vmatprep.subr.bf16.mxu1 %v527_v2 }
  0x13   : > { %485 = vmatpush3.bf16.msra.mxu0 %v513_v3 }
  0x15   : > { %493 = vmatpush3.bf16.msra.mxu1 %v516_v6 }
  0x16   : > { %487 = vmatmul.mubr.msk.bf16.vlgmr.msra.gmra.mxu0 %vm261_vm1, %v514_v5  ;;  %494 = vmatprep.subr.bf16.mxu1 %v527_v2 }
  0x19   : > { %495 = vmatpush3.bf16.msra.mxu1 %v517_v7 }
  0x1a   : > { %496 = vmatprep.subr.bf16.mxu1 %v527_v2 }
  0x1d   : > { %497 = vmatpush3.bf16.msra.mxu1 %v518_v8 }
  0xd6   : > { %v299_v10 = vpop.f32.mrf.mxu0 }
  0xd7   : > { %v300_v12 = vadd.f32 %v461_v9, %v299_v10 }
  0xd8   : > { %v488_v11 = vpop.f32.mrf.mxu0 }
  0xd9   : > { %v306_v16 = vmax.f32 %v300_v12, 0.0 }
  0xda   : > { %v302_v13 = vpop.f32.mrf.mxu0 }
  0xdb   : > { %v303_v14 = vadd.f32 %v461_v9, %v302_v13 }
  0xdc   : > { %v489_v15 = vpop.f32.mrf.mxu0 }
  0xdd   : > { %v307_v17 = vmax.f32 %v303_v14, 0.0 }
  0xdf   : > { %v308_v18 = vpack.c.bf16 %v307_v17, %v306_v16 }
  0xe1   : > { %499 = vmatmul.mubr.msk.bf16.vlgmr.msra.gmra.mxu1 %vm348_vm2, %v308_v18 }
 0x1a1   : > { %v386_v20 = vpop.f32.mrf.mxu1 }
 0x1a2   : > { %v387_v21 = vadd.f32 %v466_v19, %v386_v20 }
 0x1a3   : > { %v500_v22 = vpop.f32.mrf.mxu1 }
 0x1a4   : > { %394 = vst.msk [vmem:[%s228_s18] sm:$0xff] %vm393_vm3, %v387_v21 }
 0x1a5   : > { %v389_v23 = vpop.f32.mrf.mxu1 }
 0x1a6   : > { %v390_v24 = vadd.f32 %v466_v19, %v389_v23 }
 0x1a7   : > { %v501_v25 = vpop.f32.mrf.mxu1 }
 0x1a8   : > { %395 = vst.msk [vmem:[%s228_s18 + $0x8] sm:$0xff] %vm393_vm3, %v390_v24 }
 0x1a9 PF: > { %s17_s20 = sadd.s32 1, %s525_s20  }
 0x1aa   : > { %p14_p4 = scmp.ge.s32.totalorder %s17_s20, 4  }
 0x1ac   :  { %16 = sbr.rel (!%p14_p4) target bundleno = 3 (0x3), region = 70 }

</bundles_post_ra>
